<compile_context>
chip_gen: v5e
topology: v5e:2x2
jax: 0.10.0
libtpu: 0.0.40
codegen_flags: <defaults>
</compile_context>

<pallas_src>
import jax
import jax.numpy as jnp
from jax.experimental import pallas as pl
from jax.experimental.pallas import tpu as pltpu


# ---------------------------------------------------------------------------
# Kernels
# ---------------------------------------------------------------------------
def _drop_path_kernel(x_ref, m_ref, o_ref):
    # (TB, TF) * (TB, 1) broadcast multiply — single VPU op per vreg.
    o_ref[...] = x_ref[...] * m_ref[...]


def _drop_path_add_kernel(r_ref, y_ref, m_ref, o_ref):
    # Fused residual add: out = residual + mask * branch.
    o_ref[...] = r_ref[...] + y_ref[...] * m_ref[...]


# ---------------------------------------------------------------------------
# Tiling helpers
# ---------------------------------------------------------------------------
def _sublane_align(dtype):
    """Rows per sublane tile: 8 (f32), 16 (bf16), 32 (int8/fp8)."""
    return max(8, 32 // jnp.dtype(dtype).itemsize)


def _tpu_generation():
    try:
        kind = jax.devices()[0].device_kind.lower()
    except Exception:
        return 0
    for g in (7, 6, 5):
        if "v{}".format(g) in kind:
            return g
    return 0


def _gen_config():
    gen = _tpu_generation()
    if gen >= 7:
        # ~3.2 TB/s HBM -> bigger blocks to amortize per-step cost; 64 MiB
        # physical VMEM -> cap footprint explicitly at 32 MiB. 2 TCs per chip.
        return dict(block_budget=24 << 20, vmem_limit_bytes=32 << 20, num_cores=2)
    if gen == 6:
        return dict(block_budget=16 << 20, vmem_limit_bytes=32 << 20, num_cores=1)
    # v5e / unknown: stay under the 16 MiB default scoped-VMEM limit.
    return dict(block_budget=8 << 20, vmem_limit_bytes=None, num_cores=1)


def _fold_rows(B, F, sub_align):
    """Fold factor k for (B, F) -> (B*k, F//k): makes the sublane dim dense
    for small batches while keeping the lane dim a multiple of 128 (unmasked
    vst). Returns 1 if no legal/beneficial fold exists."""
    if B >= sub_align:
        return 1
    for k in range(2, sub_align + 1):
        if F % k == 0 and (B * k) % sub_align == 0 \
                and (F // k) >= 128 and (F // k) % 128 == 0:
            return k
    return 1


def _choose_tiles(B, F, itemsize, sub_align, target_bytes, min_steps):
    """Pick (TB, TF): ~target_bytes blocks obeying TPU (8,128) block rules,
    then split until there are >= min_steps grid steps (blocks stay >= 1 MiB)."""
    # Rows per block: multiple of sub_align, or the full dim.
    if B <= sub_align:
        TB = B
    else:
        rows = max(sub_align, target_bytes // max(1, F * itemsize))
        TB = min((rows // sub_align) * sub_align, (B // sub_align) * sub_align)
        TB = max(TB, sub_align)

    # Lanes per block: multiple of 128, or the full dim.
    lanes = max(128, target_bytes // max(1, TB * itemsize))
    TF = (lanes // 128) * 128
    if TF >= F:
        TF = F

    min_block = 1 << 20

    def _steps(tb, tf):
        return pl.cdiv(B, tb) * pl.cdiv(F, tf)

    while _steps(TB, TF) < min_steps:
        new_tf = max(128, (TF // 2 // 128) * 128)
        new_tb = max(sub_align, (TB // 2 // sub_align) * sub_align)
        if TF > 128 and TB * new_tf * itemsize >= min_block:
            TF = new_tf
        elif TB > sub_align and new_tb * TF * itemsize >= min_block:
            TB = new_tb
        else:
            break
    return TB, TF


def _prepare(x, key, keep_prob, scale_by_keep):
    """Lane-dense 2-D slab + per-row scaled mask (+ sublane fold for small B)."""
    B = x.shape[0]
    x2 = x.reshape(B, -1)
    F = x2.shape[1]
    dtype = x.dtype
    itemsize = jnp.dtype(dtype).itemsize
    sub_align = _sublane_align(dtype)

    # Per-sample Bernoulli(keep_prob) with 1/keep_prob folded in (single where).
    scale = (1.0 / keep_prob) if (scale_by_keep and keep_prob > 0.0) else 1.0
    bern = jax.random.bernoulli(key, p=keep_prob, shape=(B, 1))
    mask = jnp.where(bern, jnp.asarray(scale, dtype), jnp.asarray(0, dtype))

    # Small-batch sublane fold (rows of each sample stay contiguous).
    k = _fold_rows(B, F, sub_align)
    if k > 1:
        x2 = x2.reshape(B * k, F // k)
        mask = jnp.repeat(mask, k, axis=0)
        B, F = B * k, F // k
    return x2, mask, B, F, itemsize, sub_align


# ---------------------------------------------------------------------------
# Public API
# ---------------------------------------------------------------------------
def drop_path(x, key, drop_prob=0.0, training=False, scale_by_keep=True):
    """Pallas TPU implementation of torcheeg's drop_path."""
    if drop_prob is None:
        drop_prob = 0.0
    if drop_prob == 0.0 or not training:
        return x
    keep_prob = 1.0 - drop_prob

    cfg = _gen_config()
    x2, mask, B, F, itemsize, sub_align = _prepare(x, key, keep_prob, scale_by_keep)

    # Two streamed tensors (x in, out), each double-buffered.
    target = max(1 << 19, cfg["block_budget"] // 4)
    TB, TF = _choose_tiles(B, F, itemsize, sub_align, target,
                           min_steps=3 * cfg["num_cores"])
    grid = (pl.cdiv(B, TB), pl.cdiv(F, TF))

    out2 = pl.pallas_call(
        _drop_path_kernel,
        out_shape=jax.ShapeDtypeStruct((B, F), x.dtype),
        grid=grid,
        in_specs=[
            pl.BlockSpec((TB, TF), lambda i, j: (i, j)),  # activation slab
            pl.BlockSpec((TB, 1), lambda i, j: (i, 0)),   # per-sample mask
        ],
        out_specs=pl.BlockSpec((TB, TF), lambda i, j: (i, j)),
        compiler_params=pltpu.CompilerParams(
            dimension_semantics=("parallel", "parallel"),
            vmem_limit_bytes=cfg["vmem_limit_bytes"]),
        input_output_aliases={0: 0},  # donate the activation's HBM buffer
    )(x2, mask)
    return out2.reshape(x.shape)


def drop_path_add(residual, x, key, drop_prob=0.0, training=False,
                  scale_by_keep=True):
    """Fused `residual + drop_path(x)` (the LaBraM call-site pattern).
    Saves one full HBM round trip of the activation vs. a standalone DropPath."""
    if drop_prob is None:
        drop_prob = 0.0
    if drop_prob == 0.0 or not training:
        return residual + x
    assert residual.shape == x.shape, "residual/branch shape mismatch"
    keep_prob = 1.0 - drop_prob

    cfg = _gen_config()
    x2, mask, B, F, itemsize, sub_align = _prepare(x, key, keep_prob, scale_by_keep)
    r2 = residual.astype(x.dtype).reshape(B, F)

    # Three streamed tensors (residual, branch, out), each double-buffered.
    target = max(1 << 19, cfg["block_budget"] // 6)
    TB, TF = _choose_tiles(B, F, itemsize, sub_align, target,
                           min_steps=3 * cfg["num_cores"])
    grid = (pl.cdiv(B, TB), pl.cdiv(F, TF))

    out2 = pl.pallas_call(
        _drop_path_add_kernel,
        out_shape=jax.ShapeDtypeStruct((B, F), x.dtype),
        grid=grid,
        in_specs=[
            pl.BlockSpec((TB, TF), lambda i, j: (i, j)),  # residual
            pl.BlockSpec((TB, TF), lambda i, j: (i, j)),  # branch output
            pl.BlockSpec((TB, 1), lambda i, j: (i, 0)),   # per-sample mask
        ],
        out_specs=pl.BlockSpec((TB, TF), lambda i, j: (i, j)),
        compiler_params=pltpu.CompilerParams(
            dimension_semantics=("parallel", "parallel"),
            vmem_limit_bytes=cfg["vmem_limit_bytes"]),
        input_output_aliases={0: 0},  # donate the residual's HBM buffer
    )(r2, x2, mask)
    return out2.reshape(residual.shape)


class DropPath:
    """Mirror of the PyTorch module (no learnable parameters)."""

    def __init__(self, drop_prob=None):
        self.drop_prob = drop_prob
        self.training = True

    def __call__(self, x, key):
        return drop_path(x, key, self.drop_prob, self.training)

    def extra_repr(self):
        return "p={}".format(self.drop_prob)


# ---------------------------------------------------------------------------
# Reference + self-test
# ---------------------------------------------------------------------------
def _reference(x, key, drop_prob, scale_by_keep=True):
    if drop_prob is None or drop_prob == 0.0:
        return x
    keep_prob = 1.0 - drop_prob
    B = x.shape[0]
    bern = jax.random.bernoulli(key, p=keep_prob, shape=(B, 1))
    scale = (1.0 / keep_prob) if (scale_by_keep and keep_prob > 0.0) else 1.0
    mask = jnp.where(bern, jnp.asarray(scale, x.dtype), jnp.asarray(0, x.dtype))
    return x * mask.reshape((B,) + (1,) * (x.ndim - 1))


if __name__ == "__main__":
    root = jax.random.PRNGKey(0)
    k_x, k_m, k_x2, k_m2, k_r = jax.random.split(root, 5)

    drop_prob = 0.3
    module = DropPath(drop_prob=drop_prob)

    # --- Small LaBraM-transformer-style shape: batch=2, seq=8, hidden=32 ---
    B, N, D = 2, 8, 32
    x = jax.random.normal(k_x, (B, N, D), dtype=jnp.float32)
    ref = _reference(x, k_m, drop_prob)          # computed before the kernel runs

    module.training = True
    out = jax.block_until_ready(module(x, k_m))
    assert out.shape == x.shape and out.dtype == x.dtype
    assert jnp.allclose(out, ref, atol=1e-6), "mismatch vs reference (small)"

    # Eval mode / drop_prob=None -> identity path (no kernel launch).
    module.training = False
    assert jnp.array_equal(jax.block_until_ready(module(x, k_m)), x)
    module.training = True
    none_module = DropPath(None)                 # drop_prob=None must not raise
    assert jnp.array_equal(jax.block_until_ready(none_module(x, k_m)), x)

    # --- Shape exercising the sublane fold (B=4 -> 8 rows) + lane tiling ---
    B2, N2, D2 = 4, 64, 256
    x_big = jax.random.normal(k_x2, (B2, N2, D2), dtype=jnp.float32)
    ref2 = _reference(x_big, k_m2, drop_prob)
    out2 = jax.block_until_ready(drop_path(x_big, k_m2, drop_prob, training=True))
    assert jnp.allclose(out2, ref2, atol=1e-6), "mismatch vs reference (tiled)"

    # --- Fused residual + DropPath (the LaBraM call-site pattern) ---
    r = jax.random.normal(k_r, (B2, N2, D2), dtype=jnp.float32)
    ref3 = r + ref2
    out3 = jax.block_until_ready(
        drop_path_add(r, x_big, k_m2, drop_prob, training=True))
    assert jnp.allclose(out3, ref3, atol=1e-5), "mismatch vs reference (fused)"

    print("KERNEL_OK")
</pallas_src>

<mosaic_0001>
module attributes {stable_mosaic.version = 11 : i64} {
  func.func @_drop_path_kernel(%arg0: i32, %arg1: i32, %arg2: memref<2x256xf32, #tpu.memory_space<vmem>>, %arg3: memref<2x1xf32, #tpu.memory_space<vmem>>, %arg4: memref<2x256xf32, #tpu.memory_space<vmem>>) attributes {dimension_semantics = [#tpu.dimension_semantics<parallel>, #tpu.dimension_semantics<parallel>], iteration_bounds = array<i64: 1, 1>, scalar_prefetch = 0 : i64, scratch_operands = 0 : i64, tpu.core_type = #tpu.core_type<tc>, window_params = [{transform_indices = @transform_0, window_bounds = array<i64: 2, 256>}, {transform_indices = @transform_1, window_bounds = array<i64: 2, 1>}, {transform_indices = @transform_2, window_bounds = array<i64: 2, 256>}]} {
    %c0 = arith.constant 0 : index
    %c0_0 = arith.constant 0 : index
    %0 = vector.load %arg2[%c0, %c0_0] : memref<2x256xf32, #tpu.memory_space<vmem>>, vector<2x256xf32>
    %c0_1 = arith.constant 0 : index
    %c0_2 = arith.constant 0 : index
    %1 = vector.load %arg3[%c0_1, %c0_2] : memref<2x1xf32, #tpu.memory_space<vmem>>, vector<2x1xf32>
    %2 = vector.broadcast %1 : vector<2x1xf32> to vector<2x256xf32>
    %3 = arith.mulf %0, %2 : vector<2x256xf32>
    %c0_3 = arith.constant 0 : index
    %c0_4 = arith.constant 0 : index
    %4 = vector.load %arg4[%c0_3, %c0_4] : memref<2x256xf32, #tpu.memory_space<vmem>>, vector<2x256xf32>
    tpu.vector_store %arg4[%c0_3, %c0_4], %3 {strides = array<i32>} : memref<2x256xf32, #tpu.memory_space<vmem>>, vector<2x256xf32>,
    return
  }
  func.func @transform_0(%arg0: i32, %arg1: i32) -> (i32, i32) {
    %c0_i32 = arith.constant 0 : i32
    return %arg0, %arg1 : i32, i32
  }
  func.func @transform_1(%arg0: i32, %arg1: i32) -> (i32, i32) {
    %c0_i32 = arith.constant 0 : i32
    %c0_i32_0 = arith.constant 0 : i32
    return %arg0, %c0_i32 : i32, i32
  }
  func.func @transform_2(%arg0: i32, %arg1: i32) -> (i32, i32) {
    %c0_i32 = arith.constant 0 : i32
    return %arg0, %arg1 : i32, i32
  }
}

</mosaic_0001>

<bundles_post_ra>
// kernel: tpu_custom_call.1
= control target key start
LH: loop header
LB: loop body
LE: loop exit
PB: predicated region body
PF: predicated region fallthrough
CT: control target
= control target key end

     0   :  { %7 = vsyncpa [#allocation3], 0  ;;  %s141_s0 = inlined_call_operand.hbm [shape: f32[2,256], index: 0, kind: input, shape index: {}, may-alias: {0,2}]   ;;  %s142_s1 = inlined_call_operand.vmem [shape: f32[2,1], index: 1, kind: input, shape index: {}]   ;;  %s143_s2 = inlined_call_operand.hbm [shape: f32[2,256], index: 2, kind: output, shape index: {}, may-alias: {0,2}]  }
   0x1   :  { %8 = vsyncpa [#allocation4], 0  ;;  %s14_s11 = sshll.u32 %s141_s0, 4  ;;  %s113_s12 = smov [#allocation2]   ;;  %s15_s11 = int_to_ptr.hbm [resolvable:$true] %s14_s11 }
   0x2   :  { %s16_s13 = sshll.u32 %s113_s12, 4  ;;  %s17_s13 = int_to_ptr.vmem [resolvable:$true] %s16_s13 }
   0x3   :  { %19 = dma.hbm_to_vmem [thread:$0]  %s15_s11, 64, %s17_s13, [#allocation3]  }
   0x4   :  { %109 = dma.done.wait [#allocation3], 64  }
   0x5   :  { %110 = vsyncadd [#allocation3], 4294967232  ;;  %v114_v0 = vmov 0   ;;  %v27_v1 = vld [vmem:[%s142_s1] sm:$0x3]  ;;  %s116_s0 = smov [#allocation5]  }
   0x6   :  { %60 = vset.pattern.permute.xlu0 %v114_v0  ;;  %v115_v2 = vmov 269488144   ;;  %v26_v6 = vld [vmem:[#allocation2] sm:$0xf]  ;;  %s44_s16 = sshll.u32 %s116_s0, 4  ;;  %s46_s19 = sshll.u32 %s143_s2, 4  ;;  %s45_s16 = int_to_ptr.vmem [resolvable:$true] %s44_s16  ;;  %s47_s19 = int_to_ptr.hbm [resolvable:$true] %s46_s19 }
   0x7   :  { %30 = vperm.xlu0 %60, %v27_v1   ;;  %v33_v3 = vunpack.c.l.s4 %v115_v2 }
   0x9   :  { %v34_v4 = vunpack.c.0.s8 %v33_v3 }
  0x79   :  { %v31_v5 = vpop.permute.xlu0 %30 }
  0x7a   :  { %v35_v7 = vperm.slane %v31_v5, %v34_v4 }
  0x7c   :  { %v37_v8 = vmul.f32 %v35_v7, %v26_v6 }
  0x7e   :  { %38 = vst [vmem:[#allocation5] sm:$0xf] %v37_v8 }
  0x7f   :  { %49 = dma.vmem_to_hbm [thread:$0]  %s45_s16, 64, %s47_s19, [#allocation4]  }
  0x80   :  { %111 = dma.done.wait [#allocation4], 64  }
  0x81   :  { %112 = vsyncadd [#allocation4], 4294967232 }
  0x82   :  { %54 = vsyncpa [#allocation3], 1 }
  0x83   :  { %55 = vsyncpa [#allocation4], 1 }

</bundles_post_ra>
